<compile_context>
chip_gen: v5e
topology: v5e:2x2
jax: 0.10.0
libtpu: 0.0.40
codegen_flags: <defaults>
</compile_context>

<pallas_src>
import functools

import jax
import jax.numpy as jnp
from jax.experimental import pallas as pl
from jax.experimental.pallas import tpu as pltpu

LANES = 128
DEFAULT_TILE_ROWS = 1024  # 1024x128 f32 = 512 KiB per input per buffer


def _round_up(x, m):
    return ((x + m - 1) // m) * m


def _sublane_multiple(dtype):
    # f32 -> 8, bf16 -> 16, int8/fp8 -> 32 (sublane packing of narrow dtypes).
    itemsize = jnp.dtype(dtype).itemsize
    return 8 * max(1, 4 // max(itemsize, 1))


def _disc_loss_kernel(pd_ref, pg_ref, out_ref, *, total_rows, tile_rows,
                      need_mask):
    """Partial sum of log(p_data * (1 - p_g)) over one (tile_rows, 128) tile.

    Each grid step writes its own scalar partial sum to out_ref[0, 0]
    (a distinct (1, 1) SMEM slot per step), so steps are independent.
    """
    pd = pd_ref[...].astype(jnp.float32)
    pg = pg_ref[...].astype(jnp.float32)

    if need_mask:
        # Last block is ragged: rows beyond `total_rows` hold undefined data.
        # Replace them with the summand's identity values before the log.
        i = pl.program_id(0)
        row = jax.lax.broadcasted_iota(jnp.int32, (tile_rows, LANES), 0)
        valid = (i * tile_rows + row) < total_rows
        pd = jnp.where(valid, pd, 1.0)  # log(1 * (1-0)) = 0
        pg = jnp.where(valid, pg, 0.0)

    # log(a) + log(b) == log(a*b): one EUP transcendental per element
    # instead of two (EUP is the binding unit here).
    terms = jnp.log(pd * (1.0 - pg))
    out_ref[0, 0] = jnp.sum(terms)


def discriminator_loss(p_data, p_g, *, tile_rows=DEFAULT_TILE_ROWS):
    """JAX/Pallas equivalent of the PyTorch discriminator_loss.forward."""
    assert p_data.shape == p_g.shape, "p_data and p_g must have the same shape"
    total_n = p_data.size
    assert total_n > 0

    # Flatten (copy-free for contiguous arrays); keep native dtype.
    pd_flat = jnp.ravel(p_data)
    pg_flat = jnp.ravel(p_g)

    # Reshape to a lane-dense (rows, 128) slab.  Only pad (which copies) in
    # the rare case where the element count is not a multiple of 128; pad
    # values are the identity of the summand so they contribute 0.
    rem = total_n % LANES
    if rem != 0:
        pad = LANES - rem
        pd_flat = jnp.pad(pd_flat, (0, pad), constant_values=1)
        pg_flat = jnp.pad(pg_flat, (0, pad), constant_values=0)
    rows = pd_flat.size // LANES
    pd2 = pd_flat.reshape(rows, LANES)
    pg2 = pg_flat.reshape(rows, LANES)

    # Sublane-aligned tile size (8-row multiple for f32, 16 for bf16, 32 for
    # 8-bit dtypes).
    sub = max(_sublane_multiple(pd2.dtype), _sublane_multiple(pg2.dtype))
    tile_rows = _round_up(min(tile_rows, rows), sub)

    num_blocks = pl.cdiv(rows, tile_rows)
    need_mask = (rows % tile_rows) != 0

    kernel = functools.partial(
        _disc_loss_kernel,
        total_rows=rows,
        tile_rows=tile_rows,
        need_mask=need_mask,
    )

    partials = pl.pallas_call(
        kernel,
        out_shape=jax.ShapeDtypeStruct((num_blocks, 1), jnp.float32),
        grid_spec=pltpu.PrefetchScalarGridSpec(
            num_scalar_prefetch=0,
            grid=(num_blocks,),
            in_specs=[
                pl.BlockSpec((tile_rows, LANES), lambda i: (i, 0)),
                pl.BlockSpec((tile_rows, LANES), lambda i: (i, 0)),
            ],
            out_specs=pl.BlockSpec(
                (1, 1), lambda i: (i, 0), memory_space=pltpu.SMEM
            ),
        ),
        compiler_params=pltpu.CompilerParams(
            # Independent per-block partial sums -> safe to shard tiles
            # across TensorCores (helps v7x; harmless on v5e/v6e).
            dimension_semantics=("parallel",),
        ),
    )(pd2, pg2)

    # Tiny finishing reduction (num_blocks scalars) + negate + mean.
    return -jnp.sum(partials) / jnp.float32(total_n)


if __name__ == "__main__":
    key = jax.random.PRNGKey(0)
    k1, k2 = jax.random.split(key)

    # Discriminator outputs are probabilities in (0, 1); keep them strictly
    # inside the open interval so log() is finite.
    shape = (2, 4, 16, 16)
    p_data = jax.random.uniform(k1, shape, dtype=jnp.float32,
                                minval=1e-3, maxval=1.0 - 1e-3)
    p_g = jax.random.uniform(k2, shape, dtype=jnp.float32,
                             minval=1e-3, maxval=1.0 - 1e-3)

    loss = discriminator_loss(p_data, p_g)
    loss = jax.block_until_ready(loss)

    # Reference check in plain JAX (same semantics as the PyTorch module).
    ref = -jnp.mean(jnp.log(p_data) + jnp.log(1.0 - p_g))
    assert jnp.allclose(loss, ref, rtol=1e-5, atol=1e-5), (loss, ref)

    print("KERNEL_OK")
</pallas_src>

<mosaic_0001>
module attributes {stable_mosaic.version = 11 : i64} {
  func.func @_disc_loss_kernel(%arg0: i32, %arg1: memref<16x128xf32, #tpu.memory_space<vmem>>, %arg2: memref<16x128xf32, #tpu.memory_space<vmem>>, %arg3: memref<1x1xf32, #tpu.memory_space<smem>>) attributes {dimension_semantics = [#tpu.dimension_semantics<parallel>], iteration_bounds = array<i64: 1>, scalar_prefetch = 0 : i64, scratch_operands = 0 : i64, tpu.core_type = #tpu.core_type<tc>, window_params = [{transform_indices = @transform_0, window_bounds = array<i64: 16, 128>}, {transform_indices = @transform_1, window_bounds = array<i64: 16, 128>}, {transform_indices = @transform_2, window_bounds = array<i64: 1, 1>}]} {
    %c0 = arith.constant 0 : index
    %c0_0 = arith.constant 0 : index
    %0 = vector.load %arg1[%c0, %c0_0] : memref<16x128xf32, #tpu.memory_space<vmem>>, vector<16x128xf32>
    %c0_1 = arith.constant 0 : index
    %c0_2 = arith.constant 0 : index
    %1 = vector.load %arg2[%c0_1, %c0_2] : memref<16x128xf32, #tpu.memory_space<vmem>>, vector<16x128xf32>
    %cst = arith.constant 1.000000e+00 : f32
    %2 = vector.broadcast %cst : f32 to vector<16x128xf32>
    %3 = arith.subf %2, %1 : vector<16x128xf32>
    %4 = arith.mulf %0, %3 : vector<16x128xf32>
    %5 = math.log %4 : vector<16x128xf32>
    %6 = vector.shape_cast %5 : vector<16x128xf32> to vector<1x16x128xf32>
    %cst_3 = arith.constant dense<0.000000e+00> : vector<1xf32>
    %7 = vector.multi_reduction <add>, %6, %cst_3 [1, 2] : vector<1x16x128xf32> to vector<1xf32>
    %8 = vector.shape_cast %7 : vector<1xf32> to vector<1x1x1xf32>
    %9 = vector.extract %8[0, 0, 0] : f32 from vector<1x1x1xf32>
    %c0_4 = arith.constant 0 : index
    %c0_5 = arith.constant 0 : index
    %10 = memref.load %arg3[%c0_4, %c0_5] : memref<1x1xf32, #tpu.memory_space<smem>>
    memref.store %9, %arg3[%c0_4, %c0_5] : memref<1x1xf32, #tpu.memory_space<smem>>
    return
  }
  func.func @transform_0(%arg0: i32) -> (i32, i32) {
    %c0_i32 = arith.constant 0 : i32
    %c0_i32_0 = arith.constant 0 : i32
    return %arg0, %c0_i32 : i32, i32
  }
  func.func @transform_1(%arg0: i32) -> (i32, i32) {
    %c0_i32 = arith.constant 0 : i32
    %c0_i32_0 = arith.constant 0 : i32
    return %arg0, %c0_i32 : i32, i32
  }
  func.func @transform_2(%arg0: i32) -> (i32, i32) {
    %c0_i32 = arith.constant 0 : i32
    %c0_i32_0 = arith.constant 0 : i32
    return %arg0, %c0_i32 : i32, i32
  }
}

</mosaic_0001>

<bundles_post_ra>
// kernel: tpu_custom_call.1
= control target key start
LH: loop header
LB: loop body
LE: loop exit
PB: predicated region body
PF: predicated region fallthrough
CT: control target
= control target key end

     0   :  { %7 = vsyncpa [#allocation3], 0  ;;  %s191_s0 = inlined_call_operand.hbm [shape: f32[16,128], index: 0, kind: input, shape index: {}]   ;;  %s192_s1 = inlined_call_operand.hbm [shape: f32[16,128], index: 1, kind: input, shape index: {}]   ;;  %s193_s2 = inlined_call_operand.hbm [shape: f32[1,1], index: 2, kind: output, shape index: {}]  }
   0x1   :  { %8 = vsyncpa [#allocation6], 0 }
   0x2   :  { %9 = vsyncpa [#allocation4], 0  ;;  %s14_s11 = sshll.u32 %s191_s0, 4  ;;  %s162_s12 = smov [#allocation2]   ;;  %s15_s11 = int_to_ptr.hbm [resolvable:$true] %s14_s11 }
   0x3   :  { %s16_s13 = sshll.u32 %s162_s12, 4  ;;  %s27_s16 = sshll.u32 %s192_s1, 4  ;;  %s17_s13 = int_to_ptr.vmem [resolvable:$true] %s16_s13  ;;  %s28_s16 = int_to_ptr.hbm [resolvable:$true] %s27_s16 }
   0x4   :  { %s163_s17 = smov 128   ;;  %s164_s18 = smov 8  }
   0x5   :  { %22 = dma.hbm_to_vmem [thread:$0]  %s15_s11, 256, %s17_s13, [#allocation3], %s163_s17, %s163_s17, %s164_s18  }
   0x6   :  { %s165_s19 = smov [#allocation5]  }
   0x7   :  { %s29_s20 = sshll.u32 %s165_s19, 4  ;;  %s30_s20 = int_to_ptr.vmem [resolvable:$true] %s29_s20 }
   0x8   :  { %35 = dma.hbm_to_vmem [thread:$0]  %s28_s16, 256, %s30_s20, [#allocation6], %s163_s17, %s163_s17, %s164_s18  }
   0x9   :  { %156 = dma.done.wait [#allocation3], 256  }
   0xa   :  { %157 = vsyncadd [#allocation3], 4294967040 }
   0xb   :  { %158 = dma.done.wait [#allocation6], 256  }
   0xc   :  { %159 = vsyncadd [#allocation6], 4294967040  ;;  %v44_v0 = vld [vmem:[#allocation2] sm:$0xff]  ;;  %v46_v1 = vld [vmem:[#allocation5] sm:$0xff]  ;;  %s73_s21 = sshll.u32 %s193_s2, 4  ;;  %s166_s23 = smov [#allocation7]   ;;  %s74_s21 = int_to_ptr.hbm [resolvable:$true] %s73_s21 }
   0xd   :  { %v45_v2 = vld [vmem:[#allocation2 + $0x8] sm:$0xff]  ;;  %v47_v3 = vld [vmem:[#allocation5 + $0x8] sm:$0xff]  ;;  %v48_v4 = vsub.f32 1.0, %v46_v1 }
   0xe   :  { %v49_v5 = vsub.f32 1.0, %v47_v3 }
   0xf   :  { %v50_v6 = vmul.f32 %v48_v4, %v44_v0 }
  0x10   :  { %v51_v7 = vmul.f32 %v49_v5, %v45_v2 }
  0x11   :  { %92 = vlog2.f32 %v50_v6 }
  0x12   :  { %94 = vlog2.f32 %v51_v7 }
  0x17   :  { %v93_v8 = vpop.eup %92 }
  0x18   :  { %v95_v9 = vpop.eup %94  ;;  %v53_v10 = vmul.f32 0.6931472, %v93_v8 }
  0x19   :  { %v55_v11 = vmul.f32 0.6931472, %v95_v9 }
  0x1b   :  { %v56_v12 = vadd.f32 %v55_v11, %v53_v10 }
  0x1d   :  { %57 = vadd.xlane.f32.xlu0 %v56_v12 }
  0x90   :  { %v58_v13 = vpop.xlane.xlu0 %57 }
  0x91   :  { %v59_v14 = vrot.slane %v58_v13, 4 }
  0x93   :  { %v60_v15 = vadd.f32 %v59_v14, %v58_v13 }
  0x95   :  { %v61_v16 = vrot.slane %v60_v15, 2 }
  0x97   :  { %v62_v17 = vadd.f32 %v61_v16, %v60_v15 }
  0x99   :  { %v63_v18 = vrot.slane %v62_v17, 1 }
  0x9b   :  { %v64_v19 = vadd.f32 %v63_v18, %v62_v17 }
  0x9d   :  { %85 = vpush %v64_v19 }
  0xce   :  { %s86_s22 = spop %85 }
  0xcf   :  { %67 = sst [smem:[#allocation7]] %s86_s22 }
  0xd0   :  { %76 = dma.smem_to_hbm %s166_s23, 16, %s74_s21, [#allocation4]  }
  0xd1   :  { %160 = dma.done.wait [#allocation4], 16  }
  0xd2   :  { %161 = vsyncadd [#allocation4], 4294967280 }
  0xd3   :  { %81 = sfence }
  0xd4   :  { %82 = vsyncpa [#allocation3], 1 }
  0xd5   :  { %83 = vsyncpa [#allocation6], 1 }
  0xd6   :  { %84 = vsyncpa [#allocation4], 1 }

</bundles_post_ra>
